<compile_context>
chip_gen: v6e
topology: v6e:2x2x1
jax: 0.10.0
libtpu: 0.0.40
codegen_flags: <defaults>
</compile_context>

<pallas_src>
import functools

import numpy as np

import jax
import jax.numpy as jnp
from jax import lax
from jax.experimental import pallas as pl
from jax.experimental.pallas import tpu as pltpu


def _round_up(x, m):
    return ((x + m - 1) // m) * m


# ---------------------------------------------------------------------------
# Small-input fast path: whole problem in one block (no grid, no padding).
# ---------------------------------------------------------------------------
def _small_cos_kernel(x_ref, inv_i_ref, inv_j_ref, c_ref):
    x = x_ref[...]
    # Contract the last dim of BOTH operands: no explicit x.T relayout.
    g = lax.dot_general(
        x, x,
        dimension_numbers=(((1,), (1,)), ((), ())),
        preferred_element_type=jnp.float32)
    c_ref[...] = g * inv_i_ref[...] * inv_j_ref[...]


# ---------------------------------------------------------------------------
# Tiled path: packed upper-triangular tile grid + resident xi row panel.
# Kernel args: (scalar-prefetch refs, inputs, outputs, scratch).
# ---------------------------------------------------------------------------
def _cos_tile_kernel(i_tbl_ref, j_tbl_ref, xi_ref, xj_ref, inv_i_ref,
                     inv_j_ref, c_ref, acc_ref):
    del i_tbl_ref, j_tbl_ref  # consumed by the index_maps only
    k = pl.program_id(1)
    block_k = xj_ref.shape[-1]

    @pl.when(k == 0)
    def _():
        acc_ref[...] = jnp.zeros_like(acc_ref)

    # xi is the full-width (block_s, D_pad) row panel resident in VMEM;
    # slice out the current K chunk (aligned, multiple of block_k).
    off = pl.multiple_of(k * block_k, block_k)
    xi = xi_ref[:, pl.ds(off, block_k)]
    # bf16 x bf16 -> f32 accumulate on the MXU; contracting the last dim of
    # both operands avoids a materialized transpose in front of the MXU.
    acc_ref[...] += lax.dot_general(
        xi, xj_ref[...],
        dimension_numbers=(((1,), (1,)), ((), ())),
        preferred_element_type=jnp.float32)

    @pl.when(k == pl.num_programs(1) - 1)
    def _():
        # Two broadcast multiplies (VPU) with precomputed 1/norm vectors.
        c_ref[...] = acc_ref[...] * inv_i_ref[...] * inv_j_ref[...]


@functools.partial(jax.jit, static_argnames=("block_s", "block_k",
                                              "compute_dtype"))
def sim_loss_cos_sim(seq_t, *, block_s=None, block_k=None,
                     compute_dtype=jnp.bfloat16):
    """Pallas implementation of SimLoss(method='cos_sim')(seq_t).

    seq_t: (S, D). Returns the S*(S-1)/2 upper-triangular (i<j) cosine
    similarities in the same row-major pair order as the PyTorch module.
    compute_dtype: dtype fed to the MXU (bf16 default; f32 accumulation
    always). Use jnp.float32 for reference-level accuracy.
    """
    S, D = seq_t.shape
    x32 = seq_t.astype(jnp.float32)

    # Inverse row norms: one O(S*D) pass in plain JAX (fused reduce + rsqrt)
    # instead of a second pallas_call launch.
    inv = lax.rsqrt(jnp.sum(jnp.square(x32), axis=-1))            # (S,)

    a_idx, b_idx = jnp.triu_indices(S, k=1)

    # ---- Small-input fast path (e.g. the module's 8x32): single block. ----
    if S <= 128 and D <= 1024:
        cos_mat = pl.pallas_call(
            _small_cos_kernel,
            out_shape=jax.ShapeDtypeStruct((S, S), jnp.float32),
        )(x32, inv.reshape(S, 1), inv.reshape(1, S))
        return cos_mat[a_idx, b_idx]

    # ---- Tiled path. ----
    if block_s is None:
        block_s = min(512, _round_up(S, 128))
    if block_k is None:
        block_k = min(512, _round_up(D, 128))
    block_s = _round_up(block_s, 128)
    block_k = _round_up(block_k, 128)

    S_pad = _round_up(S, block_s)
    D_pad = _round_up(D, block_k)

    x = seq_t.astype(compute_dtype)
    if (S_pad, D_pad) != (S, D):
        x = jnp.pad(x, ((0, S_pad - S), (0, D_pad - D)))

    # Pad 1/norm with 1.0 so the computed region of cos_mat stays finite
    # (padded rows contribute 0-valued gram entries and are never gathered).
    inv_row = jnp.pad(inv, (0, S_pad - S),
                      constant_values=1.0).reshape(S_pad, 1)
    inv_col = inv_row.reshape(1, S_pad)

    gs = S_pad // block_s
    gk = D_pad // block_k

    # Packed upper-triangular tile list (ti <= tj), row-major: lower-triangle
    # tiles are never DMA'd, computed, or written back.
    pairs = np.array([(ti, tj) for ti in range(gs) for tj in range(ti, gs)],
                     dtype=np.int32)
    num_tiles = int(pairs.shape[0])
    i_tbl = jnp.asarray(pairs[:, 0])
    j_tbl = jnp.asarray(pairs[:, 1])

    itemsize = jnp.dtype(compute_dtype).itemsize

    cos_mat = pl.pallas_call(
        _cos_tile_kernel,
        out_shape=jax.ShapeDtypeStruct((S_pad, S_pad), jnp.float32),
        grid_spec=pltpu.PrefetchScalarGridSpec(
            num_scalar_prefetch=2,
            grid=(num_tiles, gk),
            in_specs=[
                # xi: full-width row panel; block index only changes with the
                # row tile -> stays resident in VMEM across the j and k sweeps.
                pl.BlockSpec((block_s, D_pad),
                             lambda t, k, it, jt: (it[t], 0)),
                pl.BlockSpec((block_s, block_k),
                             lambda t, k, it, jt: (jt[t], k)),
                pl.BlockSpec((block_s, 1),
                             lambda t, k, it, jt: (it[t], 0)),
                pl.BlockSpec((1, block_s),
                             lambda t, k, it, jt: (0, jt[t])),
            ],
            out_specs=pl.BlockSpec((block_s, block_s),
                                   lambda t, k, it, jt: (it[t], jt[t])),
            scratch_shapes=[pltpu.VMEM((block_s, block_s), jnp.float32)],
        ),
        compiler_params=pltpu.CompilerParams(
            # Packed tile axis is independent -> "parallel" (v7x megacore
            # splits the triangular tile list evenly); K reduction last.
            dimension_semantics=("parallel", "arbitrary"),
            vmem_limit_bytes=48 * 1024 * 1024),
        cost_estimate=pl.CostEstimate(
            flops=2 * num_tiles * block_s * block_s * D_pad,
            transcendentals=0,
            bytes_accessed=(gs * block_s * D_pad * itemsize            # xi panels
                            + num_tiles * block_s * D_pad * itemsize   # xj tiles
                            + num_tiles * block_s * block_s * 4),      # output
        ),
    )(i_tbl, j_tbl, x, x, inv_row, inv_col)

    # Strict upper-triangular (i < j) pairs, row-major order — identical
    # ordering to torch.where(torch.triu(1 - torch.eye(S))). Only visited
    # (ti <= tj) tiles are ever read.
    return cos_mat[a_idx, b_idx]


def _reference_cos_sim(seq_t):
    """Pure-JAX reference mirroring the PyTorch forward, for verification."""
    S = seq_t.shape[0]
    a, b = jnp.triu_indices(S, k=1)
    norm = jnp.linalg.norm(seq_t, axis=-1)
    return jnp.sum(seq_t[a] * seq_t[b], axis=-1) / (norm[a] * norm[b])


if __name__ == "__main__":
    key = jax.random.PRNGKey(0)

    # Shapes implied by the module: seq_len=8, hidden=32 (single-block path).
    S, D = 8, 32
    seq_t = jax.random.normal(key, (S, D), dtype=jnp.float32)
    out = jax.block_until_ready(sim_loss_cos_sim(seq_t))
    ref = _reference_cos_sim(seq_t)
    assert out.shape == (S * (S - 1) // 2,)
    assert jnp.allclose(out, ref, atol=1e-5, rtol=1e-5)

    # Multi-tile path, f32 MXU inputs (tight tolerance): exercises padding
    # (200->256, 300->384), the packed triangular grid (gs=2 -> 3 tiles),
    # the K-axis accumulator (gk=3) and the resident xi panel.
    S2, D2 = 200, 300
    seq_t2 = jax.random.normal(jax.random.PRNGKey(1), (S2, D2),
                               dtype=jnp.float32)
    ref2 = _reference_cos_sim(seq_t2)
    out2_f32 = jax.block_until_ready(
        sim_loss_cos_sim(seq_t2, block_s=128, block_k=128,
                         compute_dtype=jnp.float32))
    assert out2_f32.shape == (S2 * (S2 - 1) // 2,)
    assert jnp.allclose(out2_f32, ref2, atol=1e-4, rtol=1e-4)

    # Same problem with the default bf16 MXU inputs (f32 accumulation):
    # faster on-chip, documented looser per-element tolerance.
    out2_bf16 = jax.block_until_ready(
        sim_loss_cos_sim(seq_t2, block_s=128, block_k=128))
    assert out2_bf16.shape == (S2 * (S2 - 1) // 2,)
    assert jnp.allclose(out2_bf16, ref2, atol=1e-2, rtol=1e-2)

    print("KERNEL_OK")
</pallas_src>

<mosaic_0001>
module attributes {stable_mosaic.version = 11 : i64} {
  func.func private @main(%arg0: i32) attributes {dimension_semantics = [#tpu.dimension_semantics<core_parallel>], iteration_bounds = array<i64: 2>, tpu.core_type = #tpu.core_type<sc_scalar_subcore>, window_params = []} {
    return
  }
}

module attributes {stable_mosaic.version = 11 : i64} {
  func.func private @main(%arg0: i32) attributes {dimension_semantics = [#tpu.dimension_semantics<core_parallel>], iteration_bounds = array<i64: 2>, tpu.core_type = #tpu.core_type<sc_scalar_subcore>, window_params = []} {
    return
  }
}

module attributes {stable_mosaic.version = 11 : i64} {
  func.func @_small_cos_kernel(%arg0: memref<8x32xf32, #tpu.memory_space<vmem>>, %arg1: memref<8x1xf32, #tpu.memory_space<vmem>>, %arg2: memref<1x8xf32, #tpu.memory_space<vmem>>, %arg3: memref<8x8xf32, #tpu.memory_space<vmem>>) attributes {dimension_semantics = [], scalar_prefetch = 0 : i64, scratch_operands = 0 : i64, tpu.core_type = #tpu.core_type<tc>} {
    %c0 = arith.constant 0 : index
    %c0_0 = arith.constant 0 : index
    %0 = vector.load %arg0[%c0, %c0_0] : memref<8x32xf32, #tpu.memory_space<vmem>>, vector<8x32xf32>
    %cst = arith.constant dense<0.000000e+00> : vector<8x8xf32>
    %1 = tpu.matmul %0, %0, %cst {dimension_numbers = #tpu.dot_dimension_numbers<[1], [1], [0], [0], [0, 0, 1, 0], [], []>} : vector<8x32xf32>, vector<8x32xf32>, vector<8x8xf32> -> vector<8x8xf32>
    %c0_1 = arith.constant 0 : index
    %c0_2 = arith.constant 0 : index
    %2 = vector.load %arg1[%c0_1, %c0_2] : memref<8x1xf32, #tpu.memory_space<vmem>>, vector<8x1xf32>
    %3 = vector.broadcast %2 : vector<8x1xf32> to vector<8x8xf32>
    %4 = arith.mulf %1, %3 : vector<8x8xf32>
    %c0_3 = arith.constant 0 : index
    %c0_4 = arith.constant 0 : index
    %5 = vector.load %arg2[%c0_3, %c0_4] : memref<1x8xf32, #tpu.memory_space<vmem>>, vector<1x8xf32>
    %6 = vector.broadcast %5 : vector<1x8xf32> to vector<8x8xf32>
    %7 = arith.mulf %4, %6 : vector<8x8xf32>
    %c0_5 = arith.constant 0 : index
    %c0_6 = arith.constant 0 : index
    %8 = vector.load %arg3[%c0_5, %c0_6] : memref<8x8xf32, #tpu.memory_space<vmem>>, vector<8x8xf32>
    tpu.vector_store %arg3[%c0_5, %c0_6], %7 {strides = array<i32>} : memref<8x8xf32, #tpu.memory_space<vmem>>, vector<8x8xf32>,
    return
  }
}

</mosaic_0001>

<bundles_post_ra>
// kernel: sim_loss_cos_sim.1
= control target key start
LH: loop header
LB: loop body
LE: loop exit
PB: predicated region body
PF: predicated region fallthrough
CT: control target
= control target key end

     0   :  { %vm15_vm0 = vcmask 261120   ;;  %v124_v0 = vmov 0.0   ;;  %vm125_vm1 = vmmov 0   ;;  %v126_v3 = vmov 0   ;;  %s159_s0 = inlined_call_operand.vmem [shape: f32[8,32], index: 0, kind: input, shape index: {}]   ;;  %s160_s1 = inlined_call_operand.vmem [shape: f32[8,1], index: 1, kind: input, shape index: {}]   ;;  %s161_s2 = inlined_call_operand.vmem [shape: f32[1,8], index: 2, kind: input, shape index: {}]   ;;  %s162_s3 = inlined_call_operand.vmem [shape: f32[8,8], index: 3, kind: output, shape index: {}]  }
   0x1   :  { %115 = vmatprep.subr.mxu0 %v124_v0  ;;  %v14_v1 = vld [vmem:[%s159_s0] sm:$0xff]  ;;  %117 = vmatprep.mubr.msk.f32.mxu0 %vm125_vm1, %v124_v0  ;;  %vm104_vm2 = vcmask 64512  }
   0x2   :  { %v89_v2 = vld [vmem:[%s160_s1] sm:$0xff]  ;;  %116 = vmatpush3.xpose.msk.msra.mxu0 %vm15_vm0, %v14_v1  ;;  %123 = vset.pattern.permute.xlu0 %v126_v3 }
   0x3   :  { %92 = vperm.xlu0 %123, %v89_v2   ;;  %v112_v6 = vld [vmem:[%s161_s2] ss:$0 sm:$0xff] }
   0x5   :  { %118 = vmatmul.mubr.msk.f32.vlgmr.msra.gmra.mxu0 %vm15_vm0, %v14_v1 }
  0x7e   :  { %v93_v4 = vpop.permute.xlu0 %92 }
  0xc5   :  { %v85_v5 = vpop.f32.mrf.mxu0 }
  0xc6   :  { %v95_v7 = vmul.f32 %v93_v4, %v85_v5 }
  0xc7   :  { %v119_v8 = vpop.f32.mrf.mxu0 }
  0xc8   :  { %v103_v9 = vmul.f32 %v112_v6, %v95_v7 }
  0xca   :  { %105 = vst.msk [vmem:[%s162_s3] sm:$0xff] %vm104_vm2, %v103_v9 }

</bundles_post_ra>
